<compile_context>
chip_gen: v7x
topology: tpu7x:2x2x1
jax: 0.10.0
libtpu: 0.0.40
codegen_flags: <defaults>
</compile_context>

<pallas_src>
import functools

import jax
import jax.numpy as jnp
from jax.experimental import pallas as pl
from jax.experimental.pallas import tpu as pltpu


# ---------------------------------------------------------------------------
# Pallas kernel: tiled y = (x @ W + b) * scale with f32 accumulation.
# ---------------------------------------------------------------------------
def _linear_kernel(scale_ref, x_ref, w_ref, b_ref, o_ref, acc_ref):
    # scale_ref: (1,1) f32 in SMEM
    # x_ref: (tm, tk) bf16   w_ref: (tk, tn) bf16
    # b_ref: (1, tn) f32     o_ref: (tm, tn) f32   acc_ref: (tm, tn) f32 VMEM
    k = pl.program_id(2)

    @pl.when(k == 0)
    def _():
        acc_ref[...] = jnp.zeros_like(acc_ref)

    acc_ref[...] += jnp.dot(
        x_ref[...], w_ref[...], preferred_element_type=jnp.float32
    )

    @pl.when(k == pl.num_programs(2) - 1)
    def _():
        scale = scale_ref[0, 0]
        # Epilogue kept in f32 (v5e VPU has no bf16); cast only at the store.
        o_ref[...] = ((acc_ref[...] + b_ref[...]) * scale).astype(o_ref.dtype)


def _round_up(v, m):
    return ((v + m - 1) // m) * m


def pallas_linear(x, w, b2d, scale, *, tm=128, tn=256, tk=256):
    """y = (x @ w + b) * scale, MXU operands in bf16, f32 accumulate."""
    B, IN = x.shape
    OUT = w.shape[1]

    # Tile sizes: never larger than the (padded) problem.  tm multiple of 16
    # (bf16 sublane packing), tn/tk multiples of 128/256 for the MXU.
    tm = min(tm, _round_up(B, 16))
    tk = min(tk, _round_up(IN, 128))
    tn = min(tn, _round_up(OUT, 128))

    Mp, Kp, Np = _round_up(B, tm), _round_up(IN, tk), _round_up(OUT, tn)

    # MXU operands in bf16; bias stays f32 for the epilogue.
    xb = x.astype(jnp.bfloat16)
    wb = w.astype(jnp.bfloat16)
    bb = b2d.astype(jnp.float32)
    if (Mp, Kp) != (B, IN):
        xb = jnp.pad(xb, ((0, Mp - B), (0, Kp - IN)))
    if (Kp, Np) != (IN, OUT):
        wb = jnp.pad(wb, ((0, Kp - IN), (0, Np - OUT)))
    if Np != OUT:
        bb = jnp.pad(bb, ((0, 0), (0, Np - OUT)))

    scale_arr = jnp.asarray(scale, dtype=jnp.float32).reshape(1, 1)

    out = pl.pallas_call(
        _linear_kernel,
        out_shape=jax.ShapeDtypeStruct((Mp, Np), jnp.float32),
        grid_spec=pltpu.PrefetchScalarGridSpec(
            num_scalar_prefetch=0,
            grid=(Mp // tm, Np // tn, Kp // tk),
            in_specs=[
                # fused scale, lives in SMEM (no HBM round-trip epilogue)
                pl.BlockSpec(memory_space=pltpu.MemorySpace.SMEM),
                pl.BlockSpec((tm, tk), lambda i, j, k: (i, k)),
                pl.BlockSpec((tk, tn), lambda i, j, k: (k, j)),
                pl.BlockSpec((1, tn), lambda i, j, k: (0, j)),
            ],
            out_specs=pl.BlockSpec((tm, tn), lambda i, j, k: (i, j)),
            scratch_shapes=[pltpu.VMEM((tm, tn), jnp.float32)],
        ),
        compiler_params=pltpu.CompilerParams(
            # M/N parallel (megacore sharding on v7x), reduction K arbitrary.
            dimension_semantics=("parallel", "parallel", "arbitrary"),
            # Conservative for v7x's 64 MiB physical VMEM; tiles are tiny.
            vmem_limit_bytes=32 * 1024 * 1024,
        ),
    )(scale_arr, xb, wb, bb)

    if (Mp, Np) != (B, OUT):
        out = out[:B, :OUT]
    return out.astype(x.dtype)


# jit the whole forward so reshape/cast/pad ops fuse and don't re-materialize.
@jax.jit
def _pallas_linear_forward(x, w, b2d, scale):
    return pallas_linear(x, w, b2d, scale)


# ---------------------------------------------------------------------------
# DummyModule: exact semantics of the PyTorch wrapper — pure delegation.
# ---------------------------------------------------------------------------
class DummyModule:
    def __init__(self, model):
        self.module = model

    def __call__(self, *xs, **kwargs):
        # forward(*xs, **kwargs) -> self.module(*xs, **kwargs)
        return self.module(*xs, **kwargs)
    # TODO(synk): the wrapped `model` is arbitrary in the original code; here
    # we only demonstrate with a Pallas-backed linear model.


# ---------------------------------------------------------------------------
# Inner demo model (deterministic params); hot path is the Pallas kernel.
# ---------------------------------------------------------------------------
class PallasLinearModel:
    def __init__(self, in_features, out_features, key):
        kw, kb = jax.random.split(key)
        self.w = jax.random.normal(
            kw, (in_features, out_features), dtype=jnp.float32) * 0.02
        # bias stored (1, OUT) at init — no per-call reshape.
        self.b = jax.random.normal(
            kb, (1, out_features), dtype=jnp.float32) * 0.01

    def __call__(self, x, scale=1.0):
        # kwargs forwarding exercised via `scale`; scale is fused in-kernel.
        return _pallas_linear_forward(x, self.w, self.b, scale)


if __name__ == "__main__":
    key = jax.random.PRNGKey(0)
    kx, kp = jax.random.split(key)

    # Small but MXU-meaningful shapes: grid = (2, 2, 2) with tm=128, tn=tk=256.
    B, IN, OUT = 256, 512, 512
    x = jax.random.normal(kx, (B, IN), dtype=jnp.float32)

    inner_model = PallasLinearModel(IN, OUT, kp)
    net = DummyModule(inner_model)

    scale = 0.5
    y = net(x, scale=scale)          # *xs and **kwargs forwarded unchanged
    y = jax.block_until_ready(y)
    assert y.shape == (B, OUT)

    # Exact-dataflow reference: bf16-rounded operands, f32 accumulate.
    xb = x.astype(jnp.bfloat16).astype(jnp.float32)
    wb = inner_model.w.astype(jnp.bfloat16).astype(jnp.float32)
    y_ref = (xb @ wb + inner_model.b) * scale
    assert jnp.allclose(y, y_ref, atol=1e-3, rtol=1e-3)

    # Loose check vs. full-precision math (bf16 operand rounding only).
    y_f32 = (x @ inner_model.w + inner_model.b) * scale
    assert jnp.allclose(y, y_f32, atol=3e-2, rtol=3e-2)

    print("KERNEL_OK")
</pallas_src>

<mosaic_0001>
module attributes {stable_mosaic.version = 11 : i64} {
  func.func @_linear_kernel(%arg0: i32, %arg1: i32, %arg2: i32, %arg3: memref<1x1xf32, #tpu.memory_space<smem>>, %arg4: memref<128x256xbf16, #tpu.memory_space<vmem>>, %arg5: memref<256x256xbf16, #tpu.memory_space<vmem>>, %arg6: memref<1x256xf32, #tpu.memory_space<vmem>>, %arg7: memref<128x256xf32, #tpu.memory_space<vmem>>, %arg8: memref<128x256xf32, #tpu.memory_space<vmem>>) attributes {dimension_semantics = [#tpu.dimension_semantics<parallel>, #tpu.dimension_semantics<parallel>, #tpu.dimension_semantics<arbitrary>], iteration_bounds = array<i64: 2, 2, 2>, scalar_prefetch = 0 : i64, scratch_operands = 1 : i64, tpu.core_type = #tpu.core_type<tc>, window_params = [{transform_indices = @transform_0, window_bounds = array<i64: 1, 1>}, {transform_indices = @transform_1, window_bounds = array<i64: 128, 256>}, {transform_indices = @transform_2, window_bounds = array<i64: 256, 256>}, {transform_indices = @transform_3, window_bounds = array<i64: 1, 256>}, {transform_indices = @transform_4, window_bounds = array<i64: 128, 256>}]} {
    %c0_i32 = arith.constant 0 : i32
    %0 = arith.cmpi eq, %arg2, %c0_i32 : i32
    %1 = arith.extui %0 : i1 to i32
    %c0_i32_0 = arith.constant 0 : i32
    %2 = arith.cmpi ne, %1, %c0_i32_0 : i32
    scf.if %2 {
      %cst_9 = arith.constant 0.000000e+00 : f32
      %12 = vector.broadcast %cst_9 : f32 to vector<128x256xf32>
      %c0_10 = arith.constant 0 : index
      %c0_11 = arith.constant 0 : index
      %13 = vector.load %arg8[%c0_10, %c0_11] : memref<128x256xf32, #tpu.memory_space<vmem>>, vector<128x256xf32>
      tpu.vector_store %arg8[%c0_10, %c0_11], %12 {strides = array<i32>} : memref<128x256xf32, #tpu.memory_space<vmem>>, vector<128x256xf32>,
    } else {
    }
    %c0 = arith.constant 0 : index
    %c0_1 = arith.constant 0 : index
    %3 = vector.load %arg8[%c0, %c0_1] : memref<128x256xf32, #tpu.memory_space<vmem>>, vector<128x256xf32>
    %c0_2 = arith.constant 0 : index
    %c0_3 = arith.constant 0 : index
    %4 = vector.load %arg4[%c0_2, %c0_3] : memref<128x256xbf16, #tpu.memory_space<vmem>>, vector<128x256xbf16>
    %c0_4 = arith.constant 0 : index
    %c0_5 = arith.constant 0 : index
    %5 = vector.load %arg5[%c0_4, %c0_5] : memref<256x256xbf16, #tpu.memory_space<vmem>>, vector<256x256xbf16>
    %cst = arith.constant dense<0.000000e+00> : vector<128x256xf32>
    %6 = tpu.matmul %4, %5, %cst {dimension_numbers = #tpu.dot_dimension_numbers<[1], [0], [0], [1], [0, 0, 1, 1], [], []>} : vector<128x256xbf16>, vector<256x256xbf16>, vector<128x256xf32> -> vector<128x256xf32>
    %7 = arith.addf %3, %6 : vector<128x256xf32>
    %c0_6 = arith.constant 0 : index
    %c0_7 = arith.constant 0 : index
    %8 = vector.load %arg8[%c0_6, %c0_7] : memref<128x256xf32, #tpu.memory_space<vmem>>, vector<128x256xf32>
    tpu.vector_store %arg8[%c0_6, %c0_7], %7 {strides = array<i32>} : memref<128x256xf32, #tpu.memory_space<vmem>>, vector<128x256xf32>,
    %c1_i32 = arith.constant 1 : i32
    %9 = arith.cmpi eq, %arg2, %c1_i32 : i32
    %10 = arith.extui %9 : i1 to i32
    %c0_i32_8 = arith.constant 0 : i32
    %11 = arith.cmpi ne, %10, %c0_i32_8 : i32
    scf.if %11 {
      %c0_9 = arith.constant 0 : index
      %c0_10 = arith.constant 0 : index
      %12 = memref.load %arg3[%c0_9, %c0_10] : memref<1x1xf32, #tpu.memory_space<smem>>
      %c0_11 = arith.constant 0 : index
      %c0_12 = arith.constant 0 : index
      %13 = vector.load %arg8[%c0_11, %c0_12] : memref<128x256xf32, #tpu.memory_space<vmem>>, vector<128x256xf32>
      %c0_13 = arith.constant 0 : index
      %c0_14 = arith.constant 0 : index
      %14 = vector.load %arg6[%c0_13, %c0_14] : memref<1x256xf32, #tpu.memory_space<vmem>>, vector<1x256xf32>
      %15 = vector.broadcast %14 : vector<1x256xf32> to vector<128x256xf32>
      %16 = arith.addf %13, %15 : vector<128x256xf32>
      %17 = vector.broadcast %12 : f32 to vector<128x256xf32>
      %18 = arith.mulf %16, %17 : vector<128x256xf32>
      %c0_15 = arith.constant 0 : index
      %c0_16 = arith.constant 0 : index
      %19 = vector.load %arg7[%c0_15, %c0_16] : memref<128x256xf32, #tpu.memory_space<vmem>>, vector<128x256xf32>
      tpu.vector_store %arg7[%c0_15, %c0_16], %18 {strides = array<i32>} : memref<128x256xf32, #tpu.memory_space<vmem>>, vector<128x256xf32>,
    } else {
    }
    return
  }
  func.func @transform_0(%arg0: i32, %arg1: i32, %arg2: i32) -> (i32, i32) {
    %c0_i32 = arith.constant 0 : i32
    %c0_i32_0 = arith.constant 0 : i32
    %c0_i32_1 = arith.constant 0 : i32
    return %c0_i32, %c0_i32_0 : i32, i32
  }
  func.func @transform_1(%arg0: i32, %arg1: i32, %arg2: i32) -> (i32, i32) {
    %c0_i32 = arith.constant 0 : i32
    return %arg0, %arg2 : i32, i32
  }
  func.func @transform_2(%arg0: i32, %arg1: i32, %arg2: i32) -> (i32, i32) {
    %c0_i32 = arith.constant 0 : i32
    return %arg2, %arg1 : i32, i32
  }
  func.func @transform_3(%arg0: i32, %arg1: i32, %arg2: i32) -> (i32, i32) {
    %c0_i32 = arith.constant 0 : i32
    %c0_i32_0 = arith.constant 0 : i32
    return %c0_i32, %arg1 : i32, i32
  }
  func.func @transform_4(%arg0: i32, %arg1: i32, %arg2: i32) -> (i32, i32) {
    %c0_i32 = arith.constant 0 : i32
    return %arg0, %arg1 : i32, i32
  }
}

</mosaic_0001>

<bundles_post_ra>
// kernel: _pallas_linear_forward.1
= control target key start
LH: loop header
LB: loop body
LE: loop exit
PB: predicated region body
PF: predicated region fallthrough
CT: control target
= control target key end

     0   :  { %s2329_s0 = inlined_call_operand.<no memory space> [shape: f32[1,1], index: 0, kind: input, shape index: {}]   ;;  %s2330_s1 = inlined_call_operand.vmem [shape: bf16[256,512], index: 1, kind: input, shape index: {}]   ;;  %s2331_s2 = inlined_call_operand.vmem [shape: bf16[512,512], index: 2, kind: input, shape index: {}]   ;;  %s2332_s3 = inlined_call_operand.vmem [shape: f32[1,512], index: 3, kind: input, shape index: {}]   ;;  %s2333_s4 = inlined_call_operand.hbm [shape: f32[256,512], index: 4, kind: output, shape index: {}]  }
   0x1   :  { %2337 = sst [smem:[#allocation13_spill]] %s2330_s1 }
   0x2   :  { %2338 = sst [smem:[#allocation14_spill]] %s2331_s2 }
   0x3   :  { %2339 = sst [smem:[#allocation15_spill]] %s2332_s3 }
   0x4   :  { %2340 = sst [smem:[#allocation16_spill]] %s2333_s4 }
   0x5   :  { %9 = sst [smem:[#allocation3]] %s2329_s0 }
   0x6   :  { %10 = vsyncpa [#allocation7], 0 }
   0x7   :  { %12 = vsyncpa [#allocation7 + $0x1], 0  ;;  %s1827_s17 = smov 0   ;;  %s1829_s18 = smov 0  }
   0x8   :  { %s1831_s19 = smov 0   ;;  %s1833_s20 = smov 0  }
   0x9   :  { %s1835_s21 = smov 0   ;;  %s1837_s22 = smov 0  }
   0xa   :  { %s1839_s23 = smov 0   ;;  %s1841_s24 = smov 0  }
   0xb   :  { %s1843_s25 = smov 0   ;;  %s1845_s0 = smov 0  }
   0xc   :  { %s1847_s26 = smov 0   ;;  %s1849_s27 = smov 0  }
   0xd   :  { %s1851_s28 = smov 0   ;;  %s1853_s29 = smov 0  }
   0xe LB: > { %2341 = sst [smem:[#allocation9_spill]] %s1768_s24  ;;  %s30_s6 = sadd.s32 1, %s1780_s26  ;;  %s1792_s29 = sphi %s1853_s29, %s18_s29   ;;  %s1788_s28 = sphi %s1851_s28, %s2375_s28   ;;  %s1784_s27 = sphi %s1849_s27, %s2374_s27   ;;  %s1780_s26 = sphi %s1847_s26, %s2373_s26   ;;  %s1776_s0 = sphi %s1845_s0, %s2372_s0   ;;  %s1772_s25 = sphi %s1843_s25, %s2371_s25   ;;  %s1768_s24 = sphi %s1841_s24, %s2370_s24   ;;  %s1764_s23 = sphi %s1839_s23, %s2369_s23   ;;  %s1760_s22 = sphi %s1837_s22, %s2368_s22   ;;  %s1756_s21 = sphi %s1835_s21, %s2367_s21   ;;  %s1752_s20 = sphi %s1833_s20, %s2366_s20   ;;  %s1748_s19 = sphi %s1831_s19, %s2365_s19   ;;  %s1744_s18 = sphi %s1829_s18, %s2364_s18   ;;  %s1740_s17 = sphi %s1827_s17, %s2363_s17  }
   0xf   : > { %2342 = sst [smem:[#allocation10_spill]] %s1776_s0  ;;  %s33_s7 = sadd.s32 1, %s1784_s27 }
  0x10   : > { %p31_p0 = scmp.ge.s32.totalorder %s30_s6, 2  ;;  %s37_s8 = sadd.s32 1, %s1788_s28 }
  0x11   : > { %s67_s9 = sadd.s32 1, %s1764_s23  ;;  %p74_p1 = scmp.ne.s32.totalorder %s1764_s23, %s1760_s22 }
  0x12   : > { %s2377_s6 = smov (%p31_p0, %s30_s6), 0  ;;  %s2379_s7 = smov (!%p31_p0, %s33_s7), %s1784_s27 }
  0x13   : > { %2343 = sst [smem:[#allocation11_spill]] %s2377_s6  ;;  %s63_s10 = ssub.s32 %s1780_s26, %s2377_s6 }
  0x14   : > { %p75_p2 = scmp.eq.s32.totalorder %s1792_s29, 0  ;;  %p35_p3 = scmp.ge.s32.totalorder %s2379_s7, 2 }
  0x15   : > { %s95_s11 = sadd.s32 1, %s1756_s21  ;;  %p102_p5 = scmp.ne.s32.totalorder %s1756_s21, %s1752_s20 }
  0x16   : > { %p1912_p4 = por %p75_p2, %p74_p1  ;;  %s2381_s7 = smov (%p35_p3, %s2379_s7), 0 }
  0x17   : > { %2345 = sst [smem:[#allocation12_spill]] %s2381_s7  ;;  %s2383_s8 = smov (!%p35_p3, %s37_s8), %s1788_s28 }
  0x18   : > { %s91_s13 = ssub.s32 %s1784_s27, %s2381_s7  ;;  %p1923_p6 = por %p102_p5, %p75_p2 }
  0x19   : > { %p39_p7 = scmp.ge.s32.totalorder %s2383_s8, 2  ;;  %s92_s15 = sor.u32 %s91_s13, %s63_s10 }
  0x1a   : > { %p93_p8 = scmp.eq.s32.totalorder %s92_s15, 0  ;;  %s149_s16 = sadd.s32 1, %s1748_s19 }
  0x1b   : > { %s2385_s8 = smov (%p39_p7, %s2383_s8), 0  ;;  %p159_p9 = scmp.ne.s32.totalorder %s1748_s19, %s1744_s18 }
  0x1c   : > { %s1931_s5 = scalar_select %p93_p8, %s1756_s21, %s95_s11  }
  0x1d   : > { %s62_s30 = ssub.s32 %s1788_s28, %s2385_s8  ;;  %s2347_s4 = sadd.s32 4294967295, %s1792_s29  }
  0x1e   : > { %s64_s6 = sor.u32 %s63_s10, %s62_s30  ;;  %s146_s7 = sor.u32 %s91_s13, %s62_s30 }
  0x1f   : > { %p65_p10 = scmp.eq.s32.totalorder %s64_s6, 0  ;;  %p147_p11 = scmp.eq.s32.totalorder %s146_s7, 0 }
  0x20   : > { %p160_p12 = scmp.eq.s32.totalorder %s2347_s4, 7  ;;  %p165_p13 = scmp.ne.s32.totalorder %s1744_s18, %s1740_s17 }
  0x21   : > { %s1942_s0 = scalar_select %p65_p10, %s1764_s23, %s67_s9  }
  0x22   : > { %s1945_s24 = scalar_select %p147_p11, %s1748_s19, %s149_s16  }
  0x23   : > { %p1947_p0 = por %p160_p12, %p159_p9  ;;  %s2349_s3 = sadd.s32 4294967294, %s1792_s29  }
  0x24   : > { %p166_p1 = scmp.eq.s32.totalorder %s2349_s3, 7  ;;  %p1347_p3 = scmp.ge.s32.totalorder %s1792_s29, 8 }
  0x26   : > { %p1953_p2 = por %p166_p1, %p165_p13  ;;  %185 = sbr.rel (%p1347_p3) target bundleno = 89 (0x59), region = 20 }
  0x2d   : > { %188 = sbr.rel (!%p1912_p4) target bundleno = 63 (0x3f), region = 24  ;;  %s190_s4 = sand.u32 (%p1912_p4), 1, %s1764_s23  }
  0x2e   : > { %s1350_s30 = sshll.u32 (%p1912_p4), %s1780_s26, 1  ;;  %s1348_s6 = sshll.u32 (%p1912_p4), %s190_s4, 7 }
  0x2f   : > { %s1420_s7 = sshll.u32 (%p1912_p4), %s1788_s28, 6  ;;  %s2351_s1 = sld [smem:[#allocation13_spill]] (%p1912_p4) }
  0x30   : > { %s196_s9 = sadd.s32 (%p1912_p4), %s1420_s7, %s1350_s30  ;;  %s192_s12 = scalar_lea.vmem (%p1912_p4), [#allocation4], %s1348_s6 }
  0x31   : > { %s1352_s10 = sshll.u32 (%p1912_p4), %s196_s9, 2 }
  0x35   : > { %s1966_s16 = scalar_lea.vmem %s2351_s1, %s1352_s10 }
  0x36   : > { %v256_v0 = vld [vmem:[%s1966_s16] sm:$0xff]  ;;  %v258_v1 = vld [vmem:[%s1966_s16 + $0x10] sm:$0xff] }
  0x37   : > { %v260_v2 = vld [vmem:[%s1966_s16 + $0x20] sm:$0xff]  ;;  %257 = vst [vmem:[%s192_s12] sm:$0xff] %v256_v0  ;;  %259 = vst [vmem:[%s192_s12 + $0x8] sm:$0xff] %v258_v1  ;;  %v262_v3 = vld [vmem:[%s1966_s16 + $0x30] sm:$0xff] }
  0x38   : > { %261 = vst [vmem:[%s192_s12 + $0x10] sm:$0xff] %v260_v2  ;;  %v264_v4 = vld [vmem:[%s1966_s16 + $0x40] sm:$0xff]  ;;  %v266_v5 = vld [vmem:[%s1966_s16 + $0x50] sm:$0xff]  ;;  %263 = vst [vmem:[%s192_s12 + $0x18] sm:$0xff] %v262_v3 }
  0x39   : > { %265 = vst [vmem:[%s192_s12 + $0x20] sm:$0xff] %v264_v4  ;;  %267 = vst [vmem:[%s192_s12 + $0x28] sm:$0xff] %v266_v5  ;;  %v268_v6 = vld [vmem:[%s1966_s16 + $0x60] sm:$0xff]  ;;  %v270_v7 = vld [vmem:[%s1966_s16 + $0x70] sm:$0xff] }
  0x3a   : > { %v272_v8 = vld [vmem:[%s1966_s16 + $0x80] sm:$0xff]  ;;  %269 = vst [vmem:[%s192_s12 + $0x30] sm:$0xff] %v268_v6  ;;  %271 = vst [vmem:[%s192_s12 + $0x38] sm:$0xff] %v270_v7  ;;  %v274_v9 = vld [vmem:[%s1966_s16 + $0x90] sm:$0xff] }
  0x3b   : > { %273 = vst [vmem:[%s192_s12 + $0x40] sm:$0xff] %v272_v8  ;;  %v276_v10 = vld [vmem:[%s1966_s16 + $0xa0] sm:$0xff]  ;;  %v278_v11 = vld [vmem:[%s1966_s16 + $0xb0] sm:$0xff]  ;;  %275 = vst [vmem:[%s192_s12 + $0x48] sm:$0xff] %v274_v9 }
  0x3c   : > { %277 = vst [vmem:[%s192_s12 + $0x50] sm:$0xff] %v276_v10  ;;  %279 = vst [vmem:[%s192_s12 + $0x58] sm:$0xff] %v278_v11  ;;  %v280_v12 = vld [vmem:[%s1966_s16 + $0xc0] sm:$0xff]  ;;  %v282_v13 = vld [vmem:[%s1966_s16 + $0xd0] sm:$0xff] }
  0x3d   : > { %v284_v14 = vld [vmem:[%s1966_s16 + $0xe0] sm:$0xff]  ;;  %281 = vst [vmem:[%s192_s12 + $0x60] sm:$0xff] %v280_v12  ;;  %283 = vst [vmem:[%s192_s12 + $0x68] sm:$0xff] %v282_v13  ;;  %v286_v15 = vld [vmem:[%s1966_s16 + $0xf0] sm:$0xff] }
  0x3e   : > { %285 = vst [vmem:[%s192_s12 + $0x70] sm:$0xff] %v284_v14  ;;  %287 = vst [vmem:[%s192_s12 + $0x78] sm:$0xff] %v286_v15 }
  0x3f PF: > { %293 = sbr.rel (!%p1923_p6) target bundleno = 89 (0x59), region = 62  ;;  %s295_s4 = sand.u32 (%p1923_p6), 1, %s1756_s21  }
  0x40   : > { %s1355_s30 = sshll.u32 (%p1923_p6), %s1784_s27, 1  ;;  %s1353_s6 = sshll.u32 (%p1923_p6), %s295_s4, 8 }
  0x41   : > { %s1421_s7 = sshll.u32 (%p1923_p6), %s1780_s26, 7  ;;  %s2352_s2 = sld [smem:[#allocation14_spill]] (%p1923_p6) }
  0x42   : > { %s301_s9 = sadd.s32 (%p1923_p6), %s1421_s7, %s1355_s30  ;;  %s1997_s14 = scalar_lea.vmem (%p1923_p6), [#allocation5], %s1353_s6 }
  0x43   : > { %s1357_s10 = sshll.u32 (%p1923_p6), %s301_s9, 2 }
  0x47   : > { %s1992_s1 = scalar_lea.vmem %s2352_s2, %s1357_s10 }
  0x48   : > { %v393_v16 = vld [vmem:[%s1992_s1] sm:$0xff]  ;;  %v395_v17 = vld [vmem:[%s1992_s1 + $0x10] sm:$0xff] }
  0x49   : > { %v397_v18 = vld [vmem:[%s1992_s1 + $0x20] sm:$0xff]  ;;  %394 = vst [vmem:[%s1997_s14] sm:$0xff] %v393_v16  ;;  %396 = vst [vmem:[%s1997_s14 + $0x8] sm:$0xff] %v395_v17  ;;  %v399_v19 = vld [vmem:[%s1992_s1 + $0x30] sm:$0xff] }
  0x4a   : > { %398 = vst [vmem:[%s1997_s14 + $0x10] sm:$0xff] %v397_v18  ;;  %v401_v20 = vld [vmem:[%s1992_s1 + $0x40] sm:$0xff]  ;;  %v403_v21 = vld [vmem:[%s1992_s1 + $0x50] sm:$0xff]  ;;  %400 = vst [vmem:[%s1997_s14 + $0x18] sm:$0xff] %v399_v19 }
  0x4b   : > { %402 = vst [vmem:[%s1997_s14 + $0x20] sm:$0xff] %v401_v20  ;;  %404 = vst [vmem:[%s1997_s14 + $0x28] sm:$0xff] %v403_v21  ;;  %v405_v22 = vld [vmem:[%s1992_s1 + $0x60] sm:$0xff]  ;;  %v407_v23 = vld [vmem:[%s1992_s1 + $0x70] sm:$0xff] }
  0x4c   : > { %v409_v24 = vld [vmem:[%s1992_s1 + $0x80] sm:$0xff]  ;;  %406 = vst [vmem:[%s1997_s14 + $0x30] sm:$0xff] %v405_v22  ;;  %408 = vst [vmem:[%s1997_s14 + $0x38] sm:$0xff] %v407_v23  ;;  %v411_v25 = vld [vmem:[%s1992_s1 + $0x90] sm:$0xff] }
  0x4d   : > { %410 = vst [vmem:[%s1997_s14 + $0x40] sm:$0xff] %v409_v24  ;;  %v413_v26 = vld [vmem:[%s1992_s1 + $0xa0] sm:$0xff]  ;;  %v415_v27 = vld [vmem:[%s1992_s1 + $0xb0] sm:$0xff]  ;;  %412 = vst [vmem:[%s1997_s14 + $0x48] sm:$0xff] %v411_v25 }
  0x4e   : > { %414 = vst [vmem:[%s1997_s14 + $0x50] sm:$0xff] %v413_v26  ;;  %416 = vst [vmem:[%s1997_s14 + $0x58] sm:$0xff] %v415_v27  ;;  %v417_v28 = vld [vmem:[%s1992_s1 + $0xc0] sm:$0xff]  ;;  %v419_v29 = vld [vmem:[%s1992_s1 + $0xd0] sm:$0xff] }
  0x4f   : > { %v421_v30 = vld [vmem:[%s1992_s1 + $0xe0] sm:$0xff]  ;;  %418 = vst [vmem:[%s1997_s14 + $0x60] sm:$0xff] %v417_v28  ;;  %420 = vst [vmem:[%s1997_s14 + $0x68] sm:$0xff] %v419_v29  ;;  %v423_v31 = vld [vmem:[%s1992_s1 + $0xf0] sm:$0xff] }
  0x50   : > { %422 = vst [vmem:[%s1997_s14 + $0x70] sm:$0xff] %v421_v30  ;;  %v425_v32 = vld [vmem:[%s1992_s1 + $0x100] sm:$0xff]  ;;  %v427_v33 = vld [vmem:[%s1992_s1 + $0x110] sm:$0xff]  ;;  %424 = vst [vmem:[%s1997_s14 + $0x78] sm:$0xff] %v423_v31 }
  0x51   : > { %426 = vst [vmem:[%s1997_s14 + $0x80] sm:$0xff] %v425_v32  ;;  %428 = vst [vmem:[%s1997_s14 + $0x88] sm:$0xff] %v427_v33  ;;  %v429_v34 = vld [vmem:[%s1992_s1 + $0x120] sm:$0xff]  ;;  %v431_v35 = vld [vmem:[%s1992_s1 + $0x130] sm:$0xff] }
  0x52   : > { %v433_v36 = vld [vmem:[%s1992_s1 + $0x140] sm:$0xff]  ;;  %430 = vst [vmem:[%s1997_s14 + $0x90] sm:$0xff] %v429_v34  ;;  %432 = vst [vmem:[%s1997_s14 + $0x98] sm:$0xff] %v431_v35  ;;  %v435_v37 = vld [vmem:[%s1992_s1 + $0x150] sm:$0xff] }
  0x53   : > { %434 = vst [vmem:[%s1997_s14 + $0xa0] sm:$0xff] %v433_v36  ;;  %v437_v38 = vld [vmem:[%s1992_s1 + $0x160] sm:$0xff]  ;;  %v439_v39 = vld [vmem:[%s1992_s1 + $0x170] sm:$0xff]  ;;  %436 = vst [vmem:[%s1997_s14 + $0xa8] sm:$0xff] %v435_v37 }
  0x54   : > { %438 = vst [vmem:[%s1997_s14 + $0xb0] sm:$0xff] %v437_v38  ;;  %440 = vst [vmem:[%s1997_s14 + $0xb8] sm:$0xff] %v439_v39  ;;  %v441_v40 = vld [vmem:[%s1992_s1 + $0x180] sm:$0xff]  ;;  %v443_v41 = vld [vmem:[%s1992_s1 + $0x190] sm:$0xff] }
  0x55   : > { %v445_v42 = vld [vmem:[%s1992_s1 + $0x1a0] sm:$0xff]  ;;  %442 = vst [vmem:[%s1997_s14 + $0xc0] sm:$0xff] %v441_v40  ;;  %444 = vst [vmem:[%s1997_s14 + $0xc8] sm:$0xff] %v443_v41  ;;  %v447_v43 = vld [vmem:[%s1992_s1 + $0x1b0] sm:$0xff] }
  0x56   : > { %446 = vst [vmem:[%s1997_s14 + $0xd0] sm:$0xff] %v445_v42  ;;  %v449_v44 = vld [vmem:[%s1992_s1 + $0x1c0] sm:$0xff]  ;;  %v451_v45 = vld [vmem:[%s1992_s1 + $0x1d0] sm:$0xff]  ;;  %448 = vst [vmem:[%s1997_s14 + $0xd8] sm:$0xff] %v447_v43 }
  0x57   : > { %450 = vst [vmem:[%s1997_s14 + $0xe0] sm:$0xff] %v449_v44  ;;  %452 = vst [vmem:[%s1997_s14 + $0xe8] sm:$0xff] %v451_v45  ;;  %v453_v46 = vld [vmem:[%s1992_s1 + $0x1e0] sm:$0xff]  ;;  %v455_v47 = vld [vmem:[%s1992_s1 + $0x1f0] sm:$0xff] }
  0x58   : > { %454 = vst [vmem:[%s1997_s14 + $0xf0] sm:$0xff] %v453_v46  ;;  %456 = vst [vmem:[%s1997_s14 + $0xf8] sm:$0xff] %v455_v47 }
  0x59 PF: > { %p1358_p4 = scmp.ge.s32.totalorder %s1792_s29, 1  ;;  %p469_p5 = scmp.lt.s32.totalorder %s1792_s29, 9 }
  0x5b   : > { %p470_p6 = pnand %p1358_p4, %p469_p5 }
  0x5c   : > { %s476_s16 = sand.u32 (!%p470_p6), 1, %s1760_s22   ;;  %s483_s12 = sand.u32 (!%p470_p6), 1, %s1752_s20  }
  0x5d   : > { %473 = sbr.rel (%p470_p6) target bundleno = 478 (0x1de), region = 104  ;;  %s1359_s4 = sshll.u32 (!%p470_p6), %s476_s16, 7 }
  0x5e   : > { %s1360_s30 = sshll.u32 (!%p470_p6), %s483_s12, 8  ;;  %s513_s1 = sand.u32 (!%p470_p6), 1, %s1744_s18  }
  0x5f   : > { %s2066_s6 = sshll.u32 (!%p470_p6), %s1772_s25, 1  ;;  %s1361_s7 = sshll.u32 (!%p470_p6), %s513_s1, 8 }
  0x60   : > { %p521_p7 = scmp.lt.s32.totalorder (!%p470_p6), %s2066_s6, 3  ;;  %s2353_s13 = sld [smem:[#allocation15_spill]] (!%p470_p6) }
  0x61   : > { %s2078_s2 = scalar_lea.vmem (!%p470_p6), [#allocation4], %s1359_s4  ;;  %s2080_s20 = scalar_lea.vmem (!%p470_p6), [#allocation5], %s1360_s30 }
  0x62   : > { %s2082_s22 = scalar_lea.vmem (!%p470_p6), [#allocation6], %s1361_s7  ;;  %s2354_s25 = sld [smem:[#allocation9_spill]] (!%p470_p6) }
  0x64   : > { %s2072_s9 = scalar_select %p521_p7, %s2066_s6, 3 }
  0x66   : > { %s523_s14 = scalar_lea.vmem %s2353_s13, %s2072_s9 }
  0x68   : > { %p1363_p8 = scmp.ne.s32.totalorder %s2354_s25, 0 }
  0x69   : > { %v1794_v48 = vmov (!%p1363_p8), 0.0  }
  0x6a   : > { %530 = sbr.rel (%p1363_p8) target bundleno = 122 (0x7a), region = 116  ;;  %531 = vst [vmem:[#allocation2] sm:$0xff] (!%p1363_p8), %v1794_v48  ;;  %532 = vst [vmem:[#allocation2 + $0x8] sm:$0xff] (!%p1363_p8), %v1794_v48 }
  0x6b   : > { %533 = vst [vmem:[#allocation2 + $0x10] sm:$0xff] (!%p1363_p8), %v1794_v48  ;;  %534 = vst [vmem:[#allocation2 + $0x18] sm:$0xff] (!%p1363_p8), %v1794_v48 }
  0x6c   : > { %535 = vst [vmem:[#allocation2 + $0x20] sm:$0xff] (!%p1363_p8), %v1794_v48  ;;  %536 = vst [vmem:[#allocation2 + $0x28] sm:$0xff] (!%p1363_p8), %v1794_v48 }
  0x6d   : > { %537 = vst [vmem:[#allocation2 + $0x30] sm:$0xff] (!%p1363_p8), %v1794_v48  ;;  %538 = vst [vmem:[#allocation2 + $0x38] sm:$0xff] (!%p1363_p8), %v1794_v48 }
  0x6e   : > { %539 = vst [vmem:[#allocation2 + $0x40] sm:$0xff] (!%p1363_p8), %v1794_v48  ;;  %540 = vst [vmem:[#allocation2 + $0x48] sm:$0xff] (!%p1363_p8), %v1794_v48 }
  0x6f   : > { %541 = vst [vmem:[#allocation2 + $0x50] sm:$0xff] (!%p1363_p8), %v1794_v48  ;;  %542 = vst [vmem:[#allocation2 + $0x58] sm:$0xff] (!%p1363_p8), %v1794_v48 }
  0x70   : > { %543 = vst [vmem:[#allocation2 + $0x60] sm:$0xff] (!%p1363_p8), %v1794_v48  ;;  %544 = vst [vmem:[#allocation2 + $0x68] sm:$0xff] (!%p1363_p8), %v1794_v48 }
  0x71   : > { %545 = vst [vmem:[#allocation2 + $0x70] sm:$0xff] %v1794_v48  ;;  %546 = vst [vmem:[#allocation2 + $0x78] sm:$0xff] %v1794_v48 }
  0x72   : > { %547 = vst [vmem:[#allocation2 + $0x80] sm:$0xff] %v1794_v48  ;;  %548 = vst [vmem:[#allocation2 + $0x88] sm:$0xff] %v1794_v48 }
  0x73   : > { %549 = vst [vmem:[#allocation2 + $0x90] sm:$0xff] %v1794_v48  ;;  %550 = vst [vmem:[#allocation2 + $0x98] sm:$0xff] %v1794_v48 }
  0x74   : > { %551 = vst [vmem:[#allocation2 + $0xa0] sm:$0xff] %v1794_v48  ;;  %552 = vst [vmem:[#allocation2 + $0xa8] sm:$0xff] %v1794_v48 }
  0x75   : > { %553 = vst [vmem:[#allocation2 + $0xb0] sm:$0xff] %v1794_v48  ;;  %554 = vst [vmem:[#allocation2 + $0xb8] sm:$0xff] %v1794_v48 }
  0x76   : > { %555 = vst [vmem:[#allocation2 + $0xc0] sm:$0xff] %v1794_v48  ;;  %556 = vst [vmem:[#allocation2 + $0xc8] sm:$0xff] %v1794_v48 }
  0x77   : > { %557 = vst [vmem:[#allocation2 + $0xd0] sm:$0xff] %v1794_v48  ;;  %558 = vst [vmem:[#allocation2 + $0xd8] sm:$0xff] %v1794_v48 }
  0x78   : > { %559 = vst [vmem:[#allocation2 + $0xe0] sm:$0xff] %v1794_v48  ;;  %560 = vst [vmem:[#allocation2 + $0xe8] sm:$0xff] %v1794_v48 }
  0x79   : > { %561 = vst [vmem:[#allocation2 + $0xf0] sm:$0xff] %v1794_v48  ;;  %562 = vst [vmem:[#allocation2 + $0xf8] sm:$0xff] %v1794_v48 }
  0x7a PF: > { %v1578_v49 = vld [vmem:[%s2080_s20 + $0x4] ss:$8 sps:$4 sm:$0xff]   ;;  %v1580_v50 = vld [vmem:[%s2080_s20] ss:$8 sps:$4 sm:$0xff]   ;;  %v1581_v51 = vld [vmem:[%s2080_s20 + $0x14] ss:$8 sps:$4 sm:$0xff]  }
  0x7b   : > { %883 = vmatprep.subr.bf16.mxu0 %v1578_v49  ;;  %1423 = vmatprep.subr.bf16.mxu1 %v1578_v49  ;;  %v1583_v52 = vld [vmem:[%s2080_s20 + $0x10] ss:$8 sps:$4 sm:$0xff]   ;;  %v1584_v53 = vld [vmem:[%s2080_s20 + $0x24] ss:$8 sps:$4 sm:$0xff]   ;;  %v1586_v54 = vld [vmem:[%s2080_s20 + $0x20] ss:$8 sps:$4 sm:$0xff]  }
  0x7c   : > { %884 = vmatpush1.bf16.msra.mxu0 %v1580_v50  ;;  %1439 = vmatpush1.bf16.msra.mxu1 %v1580_v50  ;;  %v1587_v55 = vld [vmem:[%s2080_s20 + $0x34] ss:$8 sps:$4 sm:$0xff]   ;;  %v1589_v56 = vld [vmem:[%s2080_s20 + $0x30] ss:$8 sps:$4 sm:$0xff]   ;;  %v1590_v57 = vld [vmem:[%s2080_s20 + $0x44] ss:$8 sps:$4 sm:$0xff]  }
  0x7d   : > { %885 = vmatprep.subr.bf16.mxu0 %v1581_v51  ;;  %1424 = vmatprep.subr.bf16.mxu1 %v1581_v51  ;;  %v1592_v58 = vld [vmem:[%s2080_s20 + $0x40] ss:$8 sps:$4 sm:$0xff]   ;;  %v1593_v59 = vld [vmem:[%s2080_s20 + $0x54] ss:$8 sps:$4 sm:$0xff]   ;;  %v1595_v60 = vld [vmem:[%s2080_s20 + $0x50] ss:$8 sps:$4 sm:$0xff]  }
  0x7e   : > { %v1596_v61 = vld [vmem:[%s2080_s20 + $0x64] ss:$8 sps:$4 sm:$0xff]   ;;  %v1598_v63 = vld [vmem:[%s2080_s20 + $0x60] ss:$8 sps:$4 sm:$0xff]   ;;  %v1599_v1 = vld [vmem:[%s2080_s20 + $0x74] ss:$8 sps:$4 sm:$0xff]  }
  0x7f   : > { %v1628_v62 = vld [vmem:[%s2078_s2 + $0x4] ss:$8 sps:$4 sm:$0xff]   ;;  %v1601_v2 = vld [vmem:[%s2080_s20 + $0x70] ss:$8 sps:$4 sm:$0xff]   ;;  %v1604_v4 = vld [vmem:[%s2080_s20 + $0x80] ss:$8 sps:$4 sm:$0xff]  }
  0x80   : > { %886 = vmatpush1.bf16.msra.mxu0 %v1583_v52  ;;  %1440 = vmatpush1.bf16.msra.mxu1 %v1583_v52  ;;  %v1631_v0 = vld [vmem:[%s2078_s2 + $0x44] ss:$8 sps:$4 sm:$0xff]   ;;  %v1605_v5 = vld [vmem:[%s2080_s20 + $0x94] ss:$8 sps:$4 sm:$0xff]   ;;  %v1607_v6 = vld [vmem:[%s2080_s20 + $0x90] ss:$8 sps:$4 sm:$0xff]  }
  0x81   : > { %887 = vmatprep.subr.bf16.mxu0 %v1584_v53  ;;  %1425 = vmatprep.subr.bf16.mxu1 %v1584_v53  ;;  %v1602_v3 = vld [vmem:[%s2080_s20 + $0x84] ss:$8 sps:$4 sm:$0xff]   ;;  %v1610_v8 = vld [vmem:[%s2080_s20 + $0xa0] ss:$8 sps:$4 sm:$0xff]   ;;  %v1611_v9 = vld [vmem:[%s2080_s20 + $0xb4] ss:$8 sps:$4 sm:$0xff]  }
  0x82   : > { %915 = vmatprep.mubr.bf16.mxu0 %v1628_v62  ;;  %955 = vmatprep.mubr.bf16.mxu1 %v1631_v0  ;;  %v1608_v7 = vld [vmem:[%s2080_s20 + $0xa4] ss:$8 sps:$4 sm:$0xff]   ;;  %v1613_v10 = vld [vmem:[%s2080_s20 + $0xb0] ss:$8 sps:$4 sm:$0xff]   ;;  %v1616_v12 = vld [vmem:[%s2080_s20 + $0xc0] ss:$8 sps:$4 sm:$0xff]  }
  0x83   : > { %v1614_v11 = vld [vmem:[%s2080_s20 + $0xc4] ss:$8 sps:$4 sm:$0xff]   ;;  %v1617_v13 = vld [vmem:[%s2080_s20 + $0xd4] ss:$8 sps:$4 sm:$0xff]   ;;  %v1619_v14 = vld [vmem:[%s2080_s20 + $0xd0] ss:$8 sps:$4 sm:$0xff]  }
  0x84   : > { %888 = vmatpush1.bf16.msra.mxu0 %v1586_v54  ;;  %1441 = vmatpush1.bf16.msra.mxu1 %v1586_v54  ;;  %v1620_v15 = vld [vmem:[%s2080_s20 + $0xe4] ss:$8 sps:$4 sm:$0xff]   ;;  %v1622_v16 = vld [vmem:[%s2080_s20 + $0xe0] ss:$8 sps:$4 sm:$0xff]   ;;  %v1623_v17 = vld [vmem:[%s2080_s20 + $0xf4] ss:$8 sps:$4 sm:$0xff]  }
  0x85   : > { %889 = vmatprep.subr.bf16.mxu0 %v1587_v55  ;;  %1426 = vmatprep.subr.bf16.mxu1 %v1587_v55  ;;  %v1625_v18 = vld [vmem:[%s2080_s20 + $0xf0] ss:$8 sps:$4 sm:$0xff]   ;;  %v1626_v19 = vld [vmem:[%s2078_s2] ss:$8 sps:$4 sm:$0xff]   ;;  %v1632_v21 = vld [vmem:[%s2078_s2 + $0x14] ss:$8 sps:$4 sm:$0xff]  }
  0x86   : > { %v1629_v20 = vld [vmem:[%s2078_s2 + $0x40] ss:$8 sps:$4 sm:$0xff]   ;;  %v1634_v22 = vld [vmem:[%s2078_s2 + $0x54] ss:$8 sps:$4 sm:$0xff]   ;;  %v1636_v23 = vld [vmem:[%s2078_s2 + $0x10] ss:$8 sps:$4 sm:$0xff]  }
  0x87   : > { %v1637_v24 = vld [vmem:[%s2078_s2 + $0x50] ss:$8 sps:$4 sm:$0xff]   ;;  %v1638_v25 = vld [vmem:[%s2078_s2 + $0x24] ss:$8 sps:$4 sm:$0xff]   ;;  %v1642_v27 = vld [vmem:[%s2078_s2 + $0x20] ss:$8 sps:$4 sm:$0xff]  }
  0x88   : > { %890 = vmatpush1.bf16.msra.mxu0 %v1589_v56  ;;  %1442 = vmatpush1.bf16.msra.mxu1 %v1589_v56  ;;  %v1640_v26 = vld [vmem:[%s2078_s2 + $0x64] ss:$8 sps:$4 sm:$0xff]   ;;  %v1643_v28 = vld [vmem:[%s2078_s2 + $0x60] ss:$8 sps:$4 sm:$0xff]   ;;  %v1644_v29 = vld [vmem:[%s2078_s2 + $0x34] ss:$8 sps:$4 sm:$0xff]  }
  0x89   : > { %891 = vmatprep.subr.bf16.mxu0 %v1590_v57  ;;  %1427 = vmatprep.subr.bf16.mxu1 %v1590_v57  ;;  %v1646_v30 = vld [vmem:[%s2078_s2 + $0x74] ss:$8 sps:$4 sm:$0xff]   ;;  %v1648_v31 = vld [vmem:[%s2078_s2 + $0x30] ss:$8 sps:$4 sm:$0xff]   ;;  %v563_v33 = vld [vmem:[#allocation2] sm:$0xff] }
  0x8a   : > { %v1649_v32 = vld [vmem:[%s2078_s2 + $0x70] ss:$8 sps:$4 sm:$0xff]   ;;  %v579_v34 = vld [vmem:[#allocation2 + $0x80] sm:$0xff]  ;;  %v564_v35 = vld [vmem:[#allocation2 + $0x8] sm:$0xff]  ;;  %s2355_s2 = sld [smem:[#allocation9_spill]] }
  0x8b   : > { %v580_v36 = vld [vmem:[#allocation2 + $0x88] sm:$0xff]  ;;  %v565_v39 = vld [vmem:[#allocation2 + $0x10] sm:$0xff]  ;;  %v566_v45 = vld [vmem:[#allocation2 + $0x18] sm:$0xff] }
  0x8c   : > { %892 = vmatpush1.bf16.msra.mxu0 %v1592_v58  ;;  %1443 = vmatpush1.bf16.msra.mxu1 %v1592_v58  ;;  %v581_v40 = vld [vmem:[#allocation2 + $0x90] sm:$0xff]  ;;  %v582_v46 = vld [vmem:[#allocation2 + $0x98] sm:$0xff]  ;;  %v567_v57 = vld [vmem:[#allocation2 + $0x20] sm:$0xff] }
  0x8d   : > { %893 = vmatprep.subr.bf16.mxu0 %v1593_v59  ;;  %1428 = vmatprep.subr.bf16.mxu1 %v1593_v59  ;;  %v583_v58 = vld [vmem:[#allocation2 + $0xa0] sm:$0xff]  ;;  %v568_v59 = vld [vmem:[#allocation2 + $0x28] sm:$0xff]  ;;  %v585_v0 = vld [vmem:[#allocation2 + $0xb0] sm:$0xff] }
  0x90   : > { %894 = vmatpush1.bf16.msra.mxu0 %v1595_v60  ;;  %1444 = vmatpush1.bf16.msra.mxu1 %v1595_v60  ;;  %v584_v60 = vld [vmem:[#allocation2 + $0xa8] sm:$0xff]  ;;  %p1412_p9 = scmp.ne.s32.totalorder %s2355_s2, 1 }
  0x91   : > { %895 = vmatprep.subr.bf16.mxu0 %v1596_v61  ;;  %1429 = vmatprep.subr.bf16.mxu1 %v1596_v61  ;;  %s1064_s16 = sld [smem:[#allocation3]] (!%p1412_p9) }
  0x94   : > { %896 = vmatpush1.bf16.msra.mxu0 %v1598_v63  ;;  %1445 = vmatpush1.bf16.msra.mxu1 %v1598_v63  ;;  %v569_v63 = vld [vmem:[#allocation2 + $0x30] sm:$0xff] }
  0x95   : > { %897 = vmatprep.subr.bf16.mxu0 %v1599_v1  ;;  %1430 = vmatprep.subr.bf16.mxu1 %v1599_v1 }
  0x98   : > { %898 = vmatpush1.bf16.msra.mxu0 %v1601_v2  ;;  %1446 = vmatpush1.bf16.msra.mxu1 %v1601_v2 }
  0x99   : > { %899 = vmatprep.subr.bf16.mxu0 %v1602_v3  ;;  %1431 = vmatprep.subr.bf16.mxu1 %v1602_v3 }
  0x9c   : > { %900 = vmatpush1.bf16.msra.mxu0 %v1604_v4  ;;  %1447 = vmatpush1.bf16.msra.mxu1 %v1604_v4 }
  0x9d   : > { %901 = vmatprep.subr.bf16.mxu0 %v1605_v5  ;;  %1432 = vmatprep.subr.bf16.mxu1 %v1605_v5  ;;  %v570_v5 = vld [vmem:[#allocation2 + $0x38] sm:$0xff] }
  0xa0   : > { %902 = vmatpush1.bf16.msra.mxu0 %v1607_v6  ;;  %1448 = vmatpush1.bf16.msra.mxu1 %v1607_v6  ;;  %v586_v6 = vld [vmem:[#allocation2 + $0xb8] sm:$0xff] }
  0xa1   : > { %903 = vmatprep.subr.bf16.mxu0 %v1608_v7  ;;  %1433 = vmatprep.subr.bf16.mxu1 %v1608_v7 }
  0xa4   : > { %904 = vmatpush1.bf16.msra.mxu0 %v1610_v8  ;;  %1449 = vmatpush1.bf16.msra.mxu1 %v1610_v8 }
  0xa5   : > { %905 = vmatprep.subr.bf16.mxu0 %v1611_v9  ;;  %1434 = vmatprep.subr.bf16.mxu1 %v1611_v9 }
  0xa8   : > { %906 = vmatpush1.bf16.msra.mxu0 %v1613_v10  ;;  %1450 = vmatpush1.bf16.msra.mxu1 %v1613_v10 }
  0xa9   : > { %907 = vmatprep.subr.bf16.mxu0 %v1614_v11  ;;  %1435 = vmatprep.subr.bf16.mxu1 %v1614_v11 }
  0xac   : > { %908 = vmatpush1.bf16.msra.mxu0 %v1616_v12  ;;  %1451 = vmatpush1.bf16.msra.mxu1 %v1616_v12 }
  0xad   : > { %909 = vmatprep.subr.bf16.mxu0 %v1617_v13  ;;  %1436 = vmatprep.subr.bf16.mxu1 %v1617_v13 }
  0xb0   : > { %910 = vmatpush1.bf16.msra.mxu0 %v1619_v14  ;;  %1452 = vmatpush1.bf16.msra.mxu1 %v1619_v14 }
  0xb1   : > { %911 = vmatprep.subr.bf16.mxu0 %v1620_v15  ;;  %1437 = vmatprep.subr.bf16.mxu1 %v1620_v15 }
  0xb4   : > { %912 = vmatpush1.bf16.msra.mxu0 %v1622_v16  ;;  %1453 = vmatpush1.bf16.msra.mxu1 %v1622_v16 }
  0xb5   : > { %913 = vmatprep.subr.bf16.mxu0 %v1623_v17  ;;  %1438 = vmatprep.subr.bf16.mxu1 %v1623_v17  ;;  %v571_v17 = vld [vmem:[#allocation2 + $0x40] sm:$0xff] }
  0xb8   : > { %914 = vmatpush1.bf16.msra.mxu0 %v1625_v18  ;;  %1454 = vmatpush1.bf16.msra.mxu1 %v1625_v18  ;;  %v587_v18 = vld [vmem:[#allocation2 + $0xc0] sm:$0xff] }
  0xbb   : > { %916 = vmatmul.mubr.bf16.vlgmr.msra.gmra.mrb[0].mxu0 %v1626_v19  ;;  %956 = vmatmul.mubr.bf16.vlgmr.msra.gmra.mrb[0].mxu1 %v1629_v20  ;;  %v572_v19 = vld [vmem:[#allocation2 + $0x48] sm:$0xff] }
  0xbc   : > { %925 = vmatprep.mubr.bf16.mxu0 %v1632_v21  ;;  %965 = vmatprep.mubr.bf16.mxu1 %v1634_v22  ;;  %v588_v20 = vld [vmem:[#allocation2 + $0xc8] sm:$0xff] }
  0xc3   : > { %926 = vmatmul.mubr.bf16.gmra.mrb[4].mxu0 %v1636_v23  ;;  %966 = vmatmul.mubr.bf16.gmra.mrb[4].mxu1 %v1637_v24  ;;  %v573_v23 = vld [vmem:[#allocation2 + $0x50] sm:$0xff] }
  0xc4   : > { %935 = vmatprep.mubr.bf16.mxu0 %v1638_v25  ;;  %975 = vmatprep.mubr.bf16.mxu1 %v1640_v26  ;;  %v589_v24 = vld [vmem:[#allocation2 + $0xd0] sm:$0xff] }
  0xcb   : > { %936 = vmatmul.mubr.bf16.gmra.mrb[8].mxu0 %v1642_v27  ;;  %976 = vmatmul.mubr.bf16.gmra.mrb[8].mxu1 %v1643_v28 }
  0xcc   : > { %945 = vmatprep.mubr.bf16.mxu0 %v1644_v29  ;;  %985 = vmatprep.mubr.bf16.mxu1 %v1646_v30  ;;  %v574_v29 = vld [vmem:[#allocation2 + $0x58] sm:$0xff] }
  0xcd   : > { %v590_v30 = vld [vmem:[#allocation2 + $0xd8] sm:$0xff] }
  0xd3   : > { %946 = vmatmul.mubr.bf16.gmra.mrb[12].mxu0 %v1648_v31  ;;  %986 = vmatmul.mubr.bf16.gmra.mrb[12].mxu1 %v1649_v32 }
 0x18e   : > { %v917_v37 = vpop.f32.mrb[0].mxu0  ;;  %v957_v38 = vpop.f32.mrb[0].mxu1 }
 0x18f   : > { %v996_v41 = vadd.f32 %v917_v37, %v563_v33  ;;  %v1012_v42 = vadd.f32 %v957_v38, %v579_v34  ;;  %v919_v43 = vpop.f32.mrb[1].mxu0  ;;  %v959_v44 = vpop.f32.mrb[1].mxu1 }
 0x190   : > { %v997_v47 = vadd.f32 %v919_v43, %v564_v35  ;;  %v1013_v48 = vadd.f32 %v959_v44, %v580_v36  ;;  %v921_v49 = vpop.f32.mrb[2].mxu0  ;;  %v961_v50 = vpop.f32.mrb[2].mxu1  ;;  %v576_v43 = vld [vmem:[#allocation2 + $0x68] sm:$0xff] }
 0x191   : > { %1028 = vst [vmem:[#allocation2] sm:$0xff] %v996_v41  ;;  %1044 = vst [vmem:[#allocation2 + $0x80] sm:$0xff] %v1012_v42  ;;  %v998_v51 = vadd.f32 %v921_v49, %v565_v39  ;;  %v1014_v52 = vadd.f32 %v961_v50, %v581_v40  ;;  %v923_v53 = vpop.f32.mrb[3].mxu0  ;;  %v963_v54 = vpop.f32.mrb[3].mxu1  ;;  %v575_v41 = vld [vmem:[#allocation2 + $0x60] sm:$0xff]  ;;  %v592_v44 = vld [vmem:[#allocation2 + $0xe8] sm:$0xff] }
 0x192   : > { %1029 = vst [vmem:[#allocation2 + $0x8] sm:$0xff] %v997_v47  ;;  %1045 = vst [vmem:[#allocation2 + $0x88] sm:$0xff] %v1013_v48  ;;  %v999_v55 = vadd.f32 %v923_v53, %v566_v45  ;;  %v1015_v56 = vadd.f32 %v963_v54, %v582_v46  ;;  %v591_v42 = vld [vmem:[#allocation2 + $0xe0] sm:$0xff]  ;;  %v577_v47 = vld [vmem:[#allocation2 + $0x70] sm:$0xff] }
 0x193   : > { %1030 = vst [vmem:[#allocation2 + $0x10] sm:$0xff] %v998_v51  ;;  %1046 = vst [vmem:[#allocation2 + $0x90] sm:$0xff] %v1014_v52  ;;  %v593_v48 = vld [vmem:[#allocation2 + $0xf0] sm:$0xff]  ;;  %v578_v53 = vld [vmem:[#allocation2 + $0x78] sm:$0xff] }
 0x194   : > { %1031 = vst [vmem:[#allocation2 + $0x18] sm:$0xff] %v999_v55  ;;  %1047 = vst [vmem:[#allocation2 + $0x98] sm:$0xff] %v1015_v56  ;;  %v594_v54 = vld [vmem:[#allocation2 + $0xf8] sm:$0xff] }
 0x196   : > { %v927_v61 = vpop.f32.mrb[4].mxu0  ;;  %v967_v62 = vpop.f32.mrb[4].mxu1 }
 0x197   : > { %v1000_v1 = vadd.f32 %v927_v61, %v567_v57  ;;  %v1016_v2 = vadd.f32 %v967_v62, %v583_v58  ;;  %v929_v3 = vpop.f32.mrb[5].mxu0  ;;  %v969_v4 = vpop.f32.mrb[5].mxu1 }
 0x198   : > { %v1001_v7 = vadd.f32 %v929_v3, %v568_v59  ;;  %v1017_v8 = vadd.f32 %v969_v4, %v584_v60  ;;  %v931_v9 = vpop.f32.mrb[6].mxu0  ;;  %v971_v10 = vpop.f32.mrb[6].mxu1  ;;  %v1097_v3 = vld [vmem:[%s523_s14] sm:$0x3] (!%p1412_p9) }
 0x199   : > { %1032 = vst [vmem:[#allocation2 + $0x20] sm:$0xff] %v1000_v1  ;;  %1048 = vst [vmem:[#allocation2 + $0xa0] sm:$0xff] %v1016_v2  ;;  %v1002_v11 = vadd.f32 %v931_v9, %v569_v63  ;;  %v1018_v12 = vadd.f32 %v971_v10, %v585_v0  ;;  %v933_v13 = vpop.f32.mrb[7].mxu0  ;;  %v973_v14 = vpop.f32.mrb[7].mxu1  ;;  %v1099_v1 = vlaneseq (!%p1412_p9)  ;;  %v1065_v4 = vld [vmem:[#allocation2] sm:$0xff] (!%p1412_p9) }
 0x19a   : > { %1033 = vst [vmem:[#allocation2 + $0x28] sm:$0xff] %v1001_v7  ;;  %1049 = vst [vmem:[#allocation2 + $0xa8] sm:$0xff] %v1017_v8  ;;  %v1003_v15 = vadd.f32 %v933_v13, %v570_v5  ;;  %v1019_v16 = vadd.f32 %v973_v14, %v586_v6  ;;  %v1066_v6 = vld [vmem:[#allocation2 + $0x8] sm:$0xff] (!%p1412_p9)  ;;  %v1067_v8 = vld [vmem:[#allocation2 + $0x10] sm:$0xff] (!%p1412_p9) }
 0x19b   : > { %1034 = vst [vmem:[#allocation2 + $0x30] sm:$0xff] %v1002_v11  ;;  %1050 = vst [vmem:[#allocation2 + $0xb0] sm:$0xff] %v1018_v12  ;;  %v1100_v2 = vshrl.u32 (!%p1412_p9), %v1099_v1, 7  ;;  %v1068_v9 = vld [vmem:[#allocation2 + $0x18] sm:$0xff] (!%p1412_p9) }
 0x19c   : > { %1035 = vst [vmem:[#allocation2 + $0x38] sm:$0xff] %v1003_v15  ;;  %1051 = vst [vmem:[#allocation2 + $0xb8] sm:$0xff] %v1019_v16  ;;  %v2143_v16 = vstv (!%p1412_p9), %s1064_s16 }
 0x19d   : > { %v1101_v5 = vsub.s32 (!%p1412_p9), 0, %v1100_v2  ;;  %v1105_v7 = vsub.s32 (!%p1412_p9), 1, %v1100_v2 }
 0x19e   : > { %v937_v21 = vpop.f32.mrb[8].mxu0  ;;  %v977_v22 = vpop.f32.mrb[8].mxu1 }
 0x19f   : > { %v1004_v25 = vadd.f32 %v937_v21, %v571_v17  ;;  %v1020_v26 = vadd.f32 %v977_v22, %v587_v18  ;;  %v939_v27 = vpop.f32.mrb[9].mxu0  ;;  %v979_v28 = vpop.f32.mrb[9].mxu1  ;;  %v2139_v11 = vrot.slane (!%p1412_p9), %v1097_v3, %v1101_v5  ;;  %v2141_v12 = vrot.slane (!%p1412_p9), %v1097_v3, %v1105_v7 }
 0x1a0   : > { %v1005_v31 = vadd.f32 %v939_v27, %v572_v19  ;;  %v1021_v32 = vadd.f32 %v979_v28, %v588_v20  ;;  %v941_v33 = vpop.f32.mrb[10].mxu0  ;;  %v981_v34 = vpop.f32.mrb[10].mxu1  ;;  %v1069_v10 = vld [vmem:[#allocation2 + $0x20] sm:$0xff] (!%p1412_p9) }
 0x1a1   : > { %1036 = vst [vmem:[#allocation2 + $0x40] sm:$0xff] %v1004_v25  ;;  %1052 = vst [vmem:[#allocation2 + $0xc0] sm:$0xff] %v1020_v26  ;;  %v1006_v35 = vadd.f32 %v941_v33, %v573_v23  ;;  %v1022_v36 = vadd.f32 %v981_v34, %v589_v24  ;;  %v943_v37 = vpop.f32.mrb[11].mxu0  ;;  %v983_v38 = vpop.f32.mrb[11].mxu1  ;;  %v1070_v13 = vld [vmem:[#allocation2 + $0x28] sm:$0xff] (!%p1412_p9)  ;;  %v1109_v17 = vadd.f32 (!%p1412_p9), %v2139_v11, %v1065_v4 }
 0x1a2   : > { %1037 = vst [vmem:[#allocation2 + $0x48] sm:$0xff] %v1005_v31  ;;  %1053 = vst [vmem:[#allocation2 + $0xc8] sm:$0xff] %v1021_v32  ;;  %v1007_v39 = vadd.f32 %v943_v37, %v574_v29  ;;  %v1023_v40 = vadd.f32 %v983_v38, %v590_v30  ;;  %v1071_v14 = vld [vmem:[#allocation2 + $0x30] sm:$0xff] (!%p1412_p9)  ;;  %v1110_v18 = vadd.f32 (!%p1412_p9), %v2141_v12, %v1066_v6 }
 0x1a3   : > { %1038 = vst [vmem:[#allocation2 + $0x50] sm:$0xff] %v1006_v35  ;;  %1054 = vst [vmem:[#allocation2 + $0xd0] sm:$0xff] %v1022_v36  ;;  %v1072_v15 = vld [vmem:[#allocation2 + $0x38] sm:$0xff] (!%p1412_p9)  ;;  %v1111_v19 = vadd.f32 (!%p1412_p9), %v2139_v11, %v1067_v8  ;;  %v1112_v20 = vadd.f32 (!%p1412_p9), %v2141_v12, %v1068_v9  ;;  %v1113_v23 = vadd.f32 (!%p1412_p9), %v2139_v11, %v1069_v10 }
 0x1a4   : > { %1039 = vst [vmem:[#allocation2 + $0x58] sm:$0xff] %v1007_v39  ;;  %1055 = vst [vmem:[#allocation2 + $0xd8] sm:$0xff] %v1023_v40  ;;  %v1114_v24 = vadd.f32 (!%p1412_p9), %v2141_v12, %v1070_v13  ;;  %v1115_v25 = vadd.f32 (!%p1412_p9), %v2139_v11, %v1071_v14  ;;  %v1116_v26 = vadd.f32 (!%p1412_p9), %v2141_v12, %v1072_v15 }
 0x1a5   : > { %v1142_v30 = vmul.f32 (!%p1412_p9), %v2143_v16, %v1109_v17  ;;  %v1143_v31 = vmul.f32 (!%p1412_p9), %v2143_v16, %v1110_v18  ;;  %v1144_v32 = vmul.f32 (!%p1412_p9), %v2143_v16, %v1111_v19  ;;  %v1145_v33 = vmul.f32 (!%p1412_p9), %v2143_v16, %v1112_v20 }
 0x1a6   : > { %v947_v45 = vpop.f32.mrb[12].mxu0  ;;  %v987_v46 = vpop.f32.mrb[12].mxu1  ;;  %1063 = sbr.rel (%p1412_p9) target bundleno = 445 (0x1bd), region = 120  ;;  %v1146_v37 = vmul.f32 (!%p1412_p9), %v2143_v16, %v1113_v23  ;;  %v1147_v38 = vmul.f32 (!%p1412_p9), %v2143_v16, %v1114_v24  ;;  %v1148_v39 = vmul.f32 (!%p1412_p9), %v2143_v16, %v1115_v25  ;;  %v1149_v40 = vmul.f32 (!%p1412_p9), %v2143_v16, %v1116_v26 }
 0x1a7   : > { %v1008_v49 = vadd.f32 %v947_v45, %v575_v41  ;;  %v1024_v50 = vadd.f32 %v987_v46, %v591_v42  ;;  %v949_v51 = vpop.f32.mrb[13].mxu0  ;;  %v989_v52 = vpop.f32.mrb[13].mxu1  ;;  %1174 = vst [vmem:[%s2082_s22] sm:$0xff] (!%p1412_p9), %v1142_v30  ;;  %1175 = vst [vmem:[%s2082_s22 + $0x8] sm:$0xff] (!%p1412_p9), %v1143_v31  ;;  %v1081_v45 = vld [vmem:[#allocation2 + $0x80] sm:$0xff] (!%p1412_p9)  ;;  %v1082_v46 = vld [vmem:[#allocation2 + $0x88] sm:$0xff] (!%p1412_p9) }
 0x1a8   : > { %v1009_v55 = vadd.f32 %v949_v51, %v576_v43  ;;  %v1025_v56 = vadd.f32 %v989_v52, %v592_v44  ;;  %v951_v57 = vpop.f32.mrb[14].mxu0  ;;  %v991_v58 = vpop.f32.mrb[14].mxu1  ;;  %v1073_v21 = vld [vmem:[#allocation2 + $0x40] sm:$0xff] (!%p1412_p9)  ;;  %1176 = vst [vmem:[%s2082_s22 + $0x10] sm:$0xff] (!%p1412_p9), %v1144_v32  ;;  %1177 = vst [vmem:[%s2082_s22 + $0x18] sm:$0xff] (!%p1412_p9), %v1145_v33  ;;  %v1083_v51 = vld [vmem:[#allocation2 + $0x90] sm:$0xff] (!%p1412_p9)  ;;  %v1125_v1 = vadd.f32 (!%p1412_p9), %v2139_v11, %v1081_v45 }
 0x1a9   : > { %1040 = vst [vmem:[#allocation2 + $0x60] sm:$0xff] %v1008_v49  ;;  %1056 = vst [vmem:[#allocation2 + $0xe0] sm:$0xff] %v1024_v50  ;;  %v1010_v59 = vadd.f32 %v951_v57, %v577_v47  ;;  %v1026_v60 = vadd.f32 %v991_v58, %v593_v48  ;;  %v953_v61 = vpop.f32.mrb[15].mxu0  ;;  %v993_v62 = vpop.f32.mrb[15].mxu1  ;;  %v1074_v22 = vld [vmem:[#allocation2 + $0x48] sm:$0xff] (!%p1412_p9)  ;;  %v1117_v41 = vadd.f32 (!%p1412_p9), %v2139_v11, %v1073_v21  ;;  %v1084_v52 = vld [vmem:[#allocation2 + $0x98] sm:$0xff] (!%p1412_p9) }
 0x1aa   : > { %1041 = vst [vmem:[#allocation2 + $0x68] sm:$0xff] %v1009_v55  ;;  %1057 = vst [vmem:[#allocation2 + $0xe8] sm:$0xff] %v1025_v56  ;;  %v1011_v63 = vadd.f32 %v953_v61, %v578_v53  ;;  %v1027_v0 = vadd.f32 %v993_v62, %v594_v54  ;;  %v1075_v27 = vld [vmem:[#allocation2 + $0x50] sm:$0xff] (!%p1412_p9)  ;;  %v1118_v42 = vadd.f32 (!%p1412_p9), %v2141_v12, %v1074_v22  ;;  %v1085_v53 = vld [vmem:[#allocation2 + $0xa0] sm:$0xff] (!%p1412_p9) }
 0x1ab   : > { %1042 = vst [vmem:[#allocation2 + $0x70] sm:$0xff] %v1010_v59  ;;  %1058 = vst [vmem:[#allocation2 + $0xf0] sm:$0xff] %v1026_v60  ;;  %v1076_v28 = vld [vmem:[#allocation2 + $0x58] sm:$0xff] (!%p1412_p9)  ;;  %v1119_v43 = vadd.f32 (!%p1412_p9), %v2139_v11, %v1075_v27  ;;  %v1150_v54 = vmul.f32 (!%p1412_p9), %v2143_v16, %v1117_v41  ;;  %v1086_v58 = vld [vmem:[#allocation2 + $0xa8] sm:$0xff] (!%p1412_p9)  ;;  %v1126_v2 = vadd.f32 (!%p1412_p9), %v2141_v12, %v1082_v46 }
 0x1ac   : > { %1043 = vst [vmem:[#allocation2 + $0x78] sm:$0xff] %v1011_v63  ;;  %1059 = vst [vmem:[#allocation2 + $0xf8] sm:$0xff] %v1027_v0  ;;  %v1120_v44 = vadd.f32 (!%p1412_p9), %v2141_v12, %v1076_v28  ;;  %v1151_v55 = vmul.f32 (!%p1412_p9), %v2143_v16, %v1118_v42  ;;  %v1087_v59 = vld [vmem:[#allocation2 + $0xb0] sm:$0xff] (!%p1412_p9)  ;;  %v1088_v60 = vld [vmem:[#allocation2 + $0xb8] sm:$0xff] (!%p1412_p9)  ;;  %v1127_v3 = vadd.f32 (!%p1412_p9), %v2139_v11, %v1083_v51 }
 0x1ad   : > { %1178 = vst [vmem:[%s2082_s22 + $0x20] sm:$0xff] %v1146_v37  ;;  %1179 = vst [vmem:[%s2082_s22 + $0x28] sm:$0xff] %v1147_v38  ;;  %v1152_v56 = vmul.f32 %v2143_v16, %v1119_v43  ;;  %v1128_v4 = vadd.f32 %v2141_v12, %v1084_v52  ;;  %v1089_v5 = vld [vmem:[#allocation2 + $0xc0] sm:$0xff]  ;;  %v1090_v6 = vld [vmem:[#allocation2 + $0xc8] sm:$0xff]  ;;  %v1129_v7 = vadd.f32 %v2139_v11, %v1085_v53 }
 0x1ae   : > { %1180 = vst [vmem:[%s2082_s22 + $0x30] sm:$0xff] %v1148_v39  ;;  %1181 = vst [vmem:[%s2082_s22 + $0x38] sm:$0xff] %v1149_v40  ;;  %v1153_v57 = vmul.f32 %v2143_v16, %v1120_v44  ;;  %v1130_v8 = vadd.f32 %v2141_v12, %v1086_v58  ;;  %v1131_v9 = vadd.f32 %v2139_v11, %v1087_v59  ;;  %v1091_v13 = vld [vmem:[#allocation2 + $0xd0] sm:$0xff]  ;;  %v1092_v14 = vld [vmem:[#allocation2 + $0xd8] sm:$0xff] }
 0x1af   : > { %1182 = vst [vmem:[%s2082_s22 + $0x40] sm:$0xff] %v1150_v54  ;;  %1183 = vst [vmem:[%s2082_s22 + $0x48] sm:$0xff] %v1151_v55  ;;  %v1132_v10 = vadd.f32 %v2141_v12, %v1088_v60  ;;  %v1158_v17 = vmul.f32 %v2143_v16, %v1125_v1  ;;  %v1159_v18 = vmul.f32 %v2143_v16, %v1126_v2 }
 0x1b0   : > { %v1077_v29 = vld [vmem:[#allocation2 + $0x60] sm:$0xff]  ;;  %1184 = vst [vmem:[%s2082_s22 + $0x50] sm:$0xff] %v1152_v56  ;;  %1185 = vst [vmem:[%s2082_s22 + $0x58] sm:$0xff] %v1153_v57  ;;  %v1160_v19 = vmul.f32 %v2143_v16, %v1127_v3  ;;  %v1161_v20 = vmul.f32 %v2143_v16, %v1128_v4  ;;  %v1162_v24 = vmul.f32 %v2143_v16, %v1129_v7 }
 0x1b1   : > { %v1078_v34 = vld [vmem:[#allocation2 + $0x68] sm:$0xff]  ;;  %v1121_v47 = vadd.f32 %v2139_v11, %v1077_v29  ;;  %v1093_v15 = vld [vmem:[#allocation2 + $0xe0] sm:$0xff]  ;;  %v1163_v25 = vmul.f32 %v2143_v16, %v1130_v8  ;;  %v1164_v26 = vmul.f32 %v2143_v16, %v1131_v9  ;;  %v1165_v27 = vmul.f32 %v2143_v16, %v1132_v10  ;;  %1190 = vst [vmem:[%s2082_s22 + $0x80] sm:$0xff] %v1158_v17 }
 0x1b2   : > { %v1079_v35 = vld [vmem:[#allocation2 + $0x70] sm:$0xff]  ;;  %v1122_v48 = vadd.f32 %v2141_v12, %v1078_v34  ;;  %v1094_v21 = vld [vmem:[#allocation2 + $0xe8] sm:$0xff]  ;;  %1191 = vst [vmem:[%s2082_s22 + $0x88] sm:$0xff] %v1159_v18  ;;  %1192 = vst [vmem:[%s2082_s22 + $0x90] sm:$0xff] %v1160_v19  ;;  %v1133_v28 = vadd.f32 %v2139_v11, %v1089_v5  ;;  %v1134_v29 = vadd.f32 %v2141_v12, %v1090_v6 }
 0x1b3   : > { %v1080_v36 = vld [vmem:[#allocation2 + $0x78] sm:$0xff]  ;;  %v1123_v49 = vadd.f32 %v2139_v11, %v1079_v35  ;;  %v1154_v61 = vmul.f32 %v2143_v16, %v1121_v47  ;;  %v1095_v22 = vld [vmem:[#allocation2 + $0xf0] sm:$0xff]  ;;  %1193 = vst [vmem:[%s2082_s22 + $0x98] sm:$0xff] %v1161_v20  ;;  %v1135_v30 = vadd.f32 %v2139_v11, %v1091_v13  ;;  %v1136_v31 = vadd.f32 %v2141_v12, %v1092_v14 }
 0x1b4   : > { %v1124_v50 = vadd.f32 %v2141_v12, %v1080_v36  ;;  %v1155_v62 = vmul.f32 %v2143_v16, %v1122_v48  ;;  %v1096_v23 = vld [vmem:[#allocation2 + $0xf8] sm:$0xff]  ;;  %1194 = vst [vmem:[%s2082_s22 + $0xa0] sm:$0xff] %v1162_v24  ;;  %1195 = vst [vmem:[%s2082_s22 + $0xa8] sm:$0xff] %v1163_v25  ;;  %v1137_v32 = vadd.f32 %v2139_v11, %v1093_v15 }
 0x1b5   : > { %v1156_v63 = vmul.f32 %v2143_v16, %v1123_v49  ;;  %1186 = vst [vmem:[%s2082_s22 + $0x60] sm:$0xff] %v1154_v61  ;;  %1196 = vst [vmem:[%s2082_s22 + $0xb0] sm:$0xff] %v1164_v26  ;;  %v1138_v33 = vadd.f32 %v2141_v12, %v1094_v21  ;;  %v1139_v34 = vadd.f32 %v2139_v11, %v1095_v22 }
 0x1b6   : > { %v1157_v0 = vmul.f32 %v2143_v16, %v1124_v50  ;;  %1187 = vst [vmem:[%s2082_s22 + $0x68] sm:$0xff] %v1155_v62  ;;  %1197 = vst [vmem:[%s2082_s22 + $0xb8] sm:$0xff] %v1165_v27  ;;  %v1140_v35 = vadd.f32 %v2141_v12, %v1096_v23  ;;  %v1166_v36 = vmul.f32 %v2143_v16, %v1133_v28 }
 0x1b7   : > { %1188 = vst [vmem:[%s2082_s22 + $0x70] sm:$0xff] %v1156_v63  ;;  %v1167_v37 = vmul.f32 %v2143_v16, %v1134_v29  ;;  %v1168_v38 = vmul.f32 %v2143_v16, %v1135_v30  ;;  %v1169_v39 = vmul.f32 %v2143_v16, %v1136_v31  ;;  %v1170_v40 = vmul.f32 %v2143_v16, %v1137_v32 }
 0x1b8   : > { %1189 = vst [vmem:[%s2082_s22 + $0x78] sm:$0xff] %v1157_v0  ;;  %v1171_v41 = vmul.f32 %v2143_v16, %v1138_v33  ;;  %v1172_v42 = vmul.f32 %v2143_v16, %v1139_v34  ;;  %v1173_v11 = vmul.f32 %v2143_v16, %v1140_v35  ;;  %1198 = vst [vmem:[%s2082_s22 + $0xc0] sm:$0xff] %v1166_v36 }
 0x1b9   : > { %1199 = vst [vmem:[%s2082_s22 + $0xc8] sm:$0xff] %v1167_v37  ;;  %1200 = vst [vmem:[%s2082_s22 + $0xd0] sm:$0xff] %v1168_v38 }
 0x1ba   : > { %1201 = vst [vmem:[%s2082_s22 + $0xd8] sm:$0xff] %v1169_v39  ;;  %1202 = vst [vmem:[%s2082_s22 + $0xe0] sm:$0xff] %v1170_v40 }
 0x1bb   : > { %1203 = vst [vmem:[%s2082_s22 + $0xe8] sm:$0xff] %v1171_v41  ;;  %1204 = vst [vmem:[%s2082_s22 + $0xf0] sm:$0xff] %v1172_v42 }
 0x1bc   : > { %1205 = vst [vmem:[%s2082_s22 + $0xf8] sm:$0xff] %v1173_v11 }
 0x1bd PF: > { %s2357_s7 = sld [smem:[#allocation10_spill]]  ;;  %s1223_s3 = sshll.u32 %s2082_s22, 4  ;;  %s2244_s3 = int_to_ptr.vmem [resolvable:$true] %s1223_s3 }
 0x1be   : > { %s2358_s25 = sld [smem:[#allocation16_spill]]  ;;  %s2253_s12 = scalar_lea.sflag [#allocation7], %s513_s1 }
 0x1bf   : > { %s1650_s4 = scalar_lea.vmem %s2244_s3, 4096 }
 0x1c0   : > { %p1651_p10 = scmp.ne.s32.totalorder %s2244_s3, %s1650_s4 }
 0x1c2   : > { %p1652_p11 = pnand %p1651_p10, %p1947_p0 }
 0x1c3   : > { %s1422_s9 = sshll.u32 %s2357_s7, 6 }
 0x1c4   : > { %s1220_s10 = sadd.s32 %s1422_s9, %s2066_s6  ;;  %s2359_s2 = smov %s2358_s25 }
 0x1c5   : > { %s1417_s13 = sshll.u32 %s1220_s10, 7  ;;  %p1653_p12 = pneg %p1652_p11 }
 0x1c6   : > { %s2249_s16 = scalar_lea.hbm %s2358_s25, %s1417_s13  ;;  %s1795_s6 = smov [#allocation6]  }
 0x1c7   : > { %s1654_s22 = sshll.u32 %s1795_s6, 4  ;;  %s1655_s22 = int_to_ptr.vmem [resolvable:$false] %s1654_s22 }
 0x1c8   : > { %s1656_s30 = scalar_lea.vmem %s1655_s22, 8192  ;;  %p1657_p13 = scmp.lt.s32.totalorder %s2244_s3, %s1655_s22 }
 0x1c9   : > { %p1658_p1 = scmp.lt.s32.totalorder %s1656_s30, %s1650_s4 }
 0x1cb   : > { %p1659_p3 = por %p1658_p1, %p1657_p13 }
 0x1cd   : > { %p1660_p4 = pnand %p1659_p3, %p1653_p12 }
 0x1cf   : > { %1663 = shalt.err (!%p1660_p4)
}
 0x1d0   : > { %s1664_s1 = scalar_lea.hbm %s2249_s16, 4096  ;;  %s1668_s10 = scalar_lea.hbm %s2359_s2, 16384 }
 0x1d1   : > { %p1665_p5 = scmp.ne.s32.totalorder %s2249_s16, %s1664_s1  ;;  %p1669_p8 = scmp.lt.u32.totalorder %s2249_s16, %s2359_s2 }
 0x1d2   : > { %p1670_p9 = scmp.lt.u32.totalorder %s1668_s10, %s1664_s1  ;;  %p1672_p11 = scmp.lt.u32.totalorder %s1664_s1, %s2249_s16 }
 0x1d3   : > { %p1666_p6 = pnand %p1665_p5, %p1947_p0 }
 0x1d4   : > { %p1671_p10 = por %p1670_p9, %p1669_p8 }
 0x1d5   : > { %p1667_p7 = pneg %p1666_p6 }
 0x1d6   : > { %p1673_p12 = por %p1672_p11, %p1671_p10 }
 0x1d8   : > { %p1674_p13 = pnand %p1673_p12, %p1667_p7 }
 0x1da   : > { %1677 = shalt.err (!%p1674_p13)
}
 0x1db   : > { %s1796_s20 = smov 256   ;;  %s1797_s25 = smov 512  }
 0x1dc   : > { %s1798_s4 = smov 16  }
 0x1dd   : > { %1455 = dma.vmem_to_hbm [thread:$0]  (%p1947_p0), %s2244_s3, 4096, %s2249_s16, %s2253_s12, %s1796_s20, %s1797_s25, %s1798_s4  }
 0x1de PF: > { %p1461_p1 = scmp.ge.s32.totalorder %s1792_s29, 2  ;;  %s1238_s6 = sand.u32 1, %s1740_s17  }
 0x1df   : > { %s1239_s22 = scalar_lea.sflag [#allocation7], %s1238_s6 }
 0x1e0   : > { %p1458_p3 = pnand %p1461_p1, %p1953_p2 }
 0x1e2   : > { %1735 = dma.done.wait (!%p1458_p3), %s1239_s22, 4096  }
 0x1e3   : > { %1737 = vsyncadd (!%p1458_p3), %s1239_s22, 4294963200  ;;  %s18_s29 = sadd.s32 1, %s1792_s29   ;;  %s2361_s15 = sld [smem:[#allocation11_spill]] }
 0x1e4   : > { %p2282_p4 = scmp.ge.s32.totalorder %s18_s29, 10   ;;  %s2362_s11 = sld [smem:[#allocation12_spill]] }
 0x1e5   : > { %s2363_s17 = smov %s1744_s18  ;;  %s2364_s18 = smov %s1748_s19 }
 0x1e6   : > { %s2365_s19 = smov %s1945_s24  ;;  %s2366_s20 = smov %s1756_s21 }
 0x1e7   : > { %s2367_s21 = smov %s1931_s5  ;;  %s2368_s22 = smov %s1764_s23 }
 0x1e8   : > { %s2369_s23 = smov %s1942_s0  ;;  %s2370_s24 = smov %s1780_s26 }
 0x1e9   : > { %s2371_s25 = smov %s1784_s27  ;;  %s2372_s0 = smov %s1788_s28 }
 0x1ea   : > { %s2373_s26 = smov %s2361_s15  ;;  %s2374_s27 = smov %s2362_s11 }
 0x1eb   : > { %s2375_s28 = smov %s2385_s8  ;;  %17 = sbr.rel (!%p2282_p4) target bundleno = 14 (0xe), region = 171 }
 0x1f2   :  { %1244 = vsyncpa [#allocation7], 1 }
 0x1f3   :  { %1246 = vsyncpa [#allocation7 + $0x1], 1 }

</bundles_post_ra>
